<compile_context>
chip_gen: v7x
topology: tpu7x:2x2x1
jax: 0.10.0
libtpu: 0.0.40
codegen_flags: <defaults>
</compile_context>

<pallas_src>
import functools

import jax
import jax.numpy as jnp
from jax import lax
from jax.experimental import pallas as pl
from jax.experimental.pallas import tpu as pltpu

_LANE = 128


def _hw_params():
    """Per-generation tile sizes / VMEM budgets."""
    try:
        vmem_cap = pltpu.get_tpu_info().vmem_capacity_bytes
    except Exception:
        vmem_cap = 128 << 20
    if vmem_cap <= (80 << 20):
        # v7x-like (64 MiB VMEM/TC, ~3.2 TB/s HBM): bigger tiles keep the
        # ~0.35us/step overhead hidden; fused whole-array path up to 8 MiB f32.
        return {"tile_rows": 8192,
                "fused_rows": (8 << 20) // (_LANE * 4),
                "fused_vmem": 48 << 20,
                "tiled_vmem": 40 << 20}
    # v5e / v6e (128 MiB VMEM): 1 MiB tiles are already ~85% of the HBM
    # roofline; fused path up to 12 MiB f32 input.
    return {"tile_rows": 2048,
            "fused_rows": (12 << 20) // (_LANE * 4),
            "fused_vmem": 100 << 20,
            "tiled_vmem": None}


# --------------------------------------------------------------------------
# Kernels
# --------------------------------------------------------------------------

def _affine_static_kernel(x_ref, o_ref, *, m, s, a0):
    """Elementwise out = (x - m) * s + a0 with compile-time constants."""
    x = x_ref[...].astype(jnp.float32)
    o_ref[...] = ((x - jnp.float32(m)) * jnp.float32(s)
                  + jnp.float32(a0)).astype(o_ref.dtype)


def _affine_kernel(m_ref, s_ref, x_ref, o_ref, *, a0):
    """Elementwise out = (x - m) * s + a0 with m, s read from SMEM."""
    x = x_ref[...].astype(jnp.float32)
    o_ref[...] = ((x - m_ref[0, 0]) * s_ref[0, 0]
                  + jnp.float32(a0)).astype(o_ref.dtype)


def _fused_kernel(tmin_ref, tmax_ref, x_ref, o_ref, mn_ref, mx_ref,
                  *, a0, span, min_val, max_val):
    """Whole-array-in-VMEM path: reduction + rescale in one kernel.

    tmin/tmax are +/-inf sentinels or the min/max of the <128-element ragged
    tail (computed outside); the resolved x_min/x_max are exported so the
    wrapper can rescale the tail with identical scalars.
    """
    x = x_ref[...].astype(jnp.float32)
    if min_val is not None:
        x_min = jnp.float32(min_val)
    else:
        x_min = jnp.minimum(jnp.min(x), tmin_ref[0, 0])
    if max_val is not None:
        x_max = jnp.float32(max_val)
    else:
        x_max = jnp.maximum(jnp.max(x), tmax_ref[0, 0])
    s = jnp.float32(span) / (x_max - x_min)
    o_ref[...] = ((x - x_min) * s + jnp.float32(a0)).astype(o_ref.dtype)
    mn_ref[0, 0] = x_min
    mx_ref[0, 0] = x_max


def _minmax_kernel(x_ref, min_ref, max_ref, vmin, vmax, *,
                   tiles_per_core, num_tiles, tile_rows, total_rows):
    """Per-core partial min/max over a lane-dense (rows, 128) slab.

    Each step folds its (tile_rows, 128) block down to an (8, 128) slab
    in-registers (leading-axis reduce = pure VPU work hidden under the DMA)
    and accumulates into small VMEM accumulators; the cross-lane scalar reduce
    runs once per core on its last step.  Clamped (duplicate) tiles are
    harmless for min/max; ragged rows are masked with +/-inf.
    """
    c = pl.program_id(0)
    i = pl.program_id(1)
    x = x_ref[...].astype(jnp.float32)

    if num_tiles * tile_rows != total_rows:
        blk = jnp.minimum(c * tiles_per_core + i, num_tiles - 1)
        row = blk * tile_rows + lax.broadcasted_iota(jnp.int32, x.shape, 0)
        ok = row < total_rows
        x_for_min = jnp.where(ok, x, jnp.inf)
        x_for_max = jnp.where(ok, x, -jnp.inf)
    else:
        x_for_min = x
        x_for_max = x

    tile_min = jnp.min(x_for_min.reshape(-1, 8, _LANE), axis=0)
    tile_max = jnp.max(x_for_max.reshape(-1, 8, _LANE), axis=0)

    @pl.when(i == 0)
    def _():
        vmin[...] = tile_min
        vmax[...] = tile_max

    @pl.when(i > 0)
    def _():
        vmin[...] = jnp.minimum(vmin[...], tile_min)
        vmax[...] = jnp.maximum(vmax[...], tile_max)

    @pl.when(i == tiles_per_core - 1)
    def _():
        min_ref[0, 0] = jnp.min(vmin[...])
        max_ref[0, 0] = jnp.max(vmax[...])


# --------------------------------------------------------------------------
# Wrapper helpers
# --------------------------------------------------------------------------

def _affine_map(kernel, x2d, out_dtype, hw, smem_args=()):
    """Tiled elementwise map over a lane-dense (rows, 128) slab."""
    rows = x2d.shape[0]
    tile_rows = min(hw["tile_rows"], rows)
    num_tiles = pl.cdiv(rows, tile_rows)
    in_specs = [pl.BlockSpec((1, 1), lambda i: (0, 0), memory_space=pltpu.SMEM)
                for _ in smem_args]
    in_specs.append(pl.BlockSpec((tile_rows, _LANE), lambda i: (i, 0)))
    return pl.pallas_call(
        kernel,
        out_shape=jax.ShapeDtypeStruct((rows, _LANE), out_dtype),
        grid=(num_tiles,),
        in_specs=in_specs,
        out_specs=pl.BlockSpec((tile_rows, _LANE), lambda i: (i, 0)),
        compiler_params=pltpu.CompilerParams(
            dimension_semantics=("parallel",),
            vmem_limit_bytes=hw["tiled_vmem"]),
    )(*smem_args, x2d)


def scale(x, a=None, b=None, min_val=None, max_val=None, *, _force_two_pass=False):
    """Pallas port of Scale.forward. a/b/min_val/max_val are python scalars or None."""
    assert (a is None) == (b is None), "must set both a and b or neither"

    orig_shape = x.shape
    out_dtype = x.dtype if jnp.issubdtype(x.dtype, jnp.floating) else jnp.float32
    a0 = float(a) if a is not None else 0.0
    span = float(b) - float(a) if a is not None else 1.0

    flat = x.reshape(-1)
    if not jnp.issubdtype(x.dtype, jnp.floating):
        # Integer inputs promote to float32, matching torch true-division.
        flat = flat.astype(jnp.float32)
    n = flat.shape[0]
    n_main = (n // _LANE) * _LANE
    rem = n - n_main
    static_mm = (min_val is not None) and (max_val is not None)
    hw = _hw_params()

    # Tiny inputs (< one lane row): not worth a kernel launch.
    if n_main == 0:
        xf = flat.astype(jnp.float32)
        x_min = jnp.float32(min_val) if min_val is not None else jnp.min(xf)
        x_max = jnp.float32(max_val) if max_val is not None else jnp.max(xf)
        s = jnp.float32(span) / (x_max - x_min)
        out = ((xf - x_min) * s + jnp.float32(a0)).astype(out_dtype)
        return out.reshape(orig_shape)

    # Lane-dense (rows, 128) view of the multiple-of-128 prefix.  No edge-pad /
    # slice round-trips: the (<128-element) tail is handled with plain jnp and
    # folded into the kernel scalars.
    main = flat[:n_main] if rem else flat
    tail = flat[n_main:] if rem else None
    x2d = main.reshape(-1, _LANE)
    rows = x2d.shape[0]

    tail_out = None

    if static_mm:
        # Pure elementwise with compile-time constants; degenerate range gives
        # the same inf/nan pattern as the reference.
        m_c = float(min_val)
        denom = float(max_val) - m_c
        if denom != 0.0:
            s_c = span / denom
        else:
            s_c = float("inf") if span > 0 else (float("-inf") if span < 0 else float("nan"))
        kern = functools.partial(_affine_static_kernel, m=m_c, s=s_c, a0=a0)
        out2d = _affine_map(kern, x2d, out_dtype, hw)
        if rem:
            tf = tail.astype(jnp.float32)
            tail_out = ((tf - jnp.float32(m_c)) * jnp.float32(s_c)
                        + jnp.float32(a0)).astype(out_dtype)

    else:
        # Data-dependent min and/or max.  Tail min/max (or +/-inf sentinels).
        if rem and min_val is None:
            tmin = jnp.min(tail.astype(jnp.float32)).reshape(1, 1)
        else:
            tmin = jnp.full((1, 1), jnp.inf, jnp.float32)
        if rem and max_val is None:
            tmax = jnp.max(tail.astype(jnp.float32)).reshape(1, 1)
        else:
            tmax = jnp.full((1, 1), -jnp.inf, jnp.float32)

        if rows <= hw["fused_rows"] and not _force_two_pass:
            # Whole array resident in VMEM: reduction + rescale in one kernel
            # (2N HBM traffic, single launch, no scalar round-trip).
            kern = functools.partial(_fused_kernel, a0=a0, span=span,
                                     min_val=min_val, max_val=max_val)
            out2d, mn_arr, mx_arr = pl.pallas_call(
                kern,
                out_shape=(jax.ShapeDtypeStruct((rows, _LANE), out_dtype),
                           jax.ShapeDtypeStruct((1, 1), jnp.float32),
                           jax.ShapeDtypeStruct((1, 1), jnp.float32)),
                in_specs=[pl.BlockSpec(memory_space=pltpu.SMEM),
                          pl.BlockSpec(memory_space=pltpu.SMEM),
                          pl.BlockSpec(memory_space=pltpu.VMEM)],
                out_specs=(pl.BlockSpec(memory_space=pltpu.VMEM),
                           pl.BlockSpec(memory_space=pltpu.SMEM),
                           pl.BlockSpec(memory_space=pltpu.SMEM)),
                compiler_params=pltpu.CompilerParams(
                    vmem_limit_bytes=hw["fused_vmem"]),
            )(tmin, tmax, x2d)
            if rem:
                x_min = mn_arr[0, 0]
                x_max = mx_arr[0, 0]
                s = jnp.float32(span) / (x_max - x_min)
                tf = tail.astype(jnp.float32)
                tail_out = ((tf - x_min) * s + jnp.float32(a0)).astype(out_dtype)

        else:
            # Large inputs: pass 1 = min/max reduction sharded over both
            # TensorCores (v7x) with (8,128) accumulators; pass 2 = FMA.
            tile_rows = min(hw["tile_rows"], (rows // 8) * 8)
            num_tiles = pl.cdiv(rows, tile_rows)
            num_cores = 2
            tpc = pl.cdiv(num_tiles, num_cores)
            kern = functools.partial(_minmax_kernel, tiles_per_core=tpc,
                                     num_tiles=num_tiles, tile_rows=tile_rows,
                                     total_rows=rows)
            pmin, pmax = pl.pallas_call(
                kern,
                out_shape=(jax.ShapeDtypeStruct((num_cores, 1), jnp.float32),
                           jax.ShapeDtypeStruct((num_cores, 1), jnp.float32)),
                grid=(num_cores, tpc),
                in_specs=[pl.BlockSpec(
                    (tile_rows, _LANE),
                    lambda c, i: (jnp.minimum(c * tpc + i, num_tiles - 1), 0))],
                out_specs=(
                    pl.BlockSpec((1, 1), lambda c, i: (c, 0),
                                 memory_space=pltpu.SMEM),
                    pl.BlockSpec((1, 1), lambda c, i: (c, 0),
                                 memory_space=pltpu.SMEM)),
                scratch_shapes=[pltpu.VMEM((8, _LANE), jnp.float32),
                                pltpu.VMEM((8, _LANE), jnp.float32)],
                compiler_params=pltpu.CompilerParams(
                    dimension_semantics=("parallel", "arbitrary"),
                    vmem_limit_bytes=hw["tiled_vmem"]),
            )(x2d)

            if min_val is not None:
                x_min = jnp.float32(min_val)
            else:
                x_min = jnp.minimum(jnp.min(pmin), tmin[0, 0])
            if max_val is not None:
                x_max = jnp.float32(max_val)
            else:
                x_max = jnp.maximum(jnp.max(pmax), tmax[0, 0])
            s = jnp.float32(span) / (x_max - x_min)
            m_arr = jnp.reshape(x_min, (1, 1)).astype(jnp.float32)
            s_arr = jnp.reshape(s, (1, 1)).astype(jnp.float32)

            kern2 = functools.partial(_affine_kernel, a0=a0)
            out2d = _affine_map(kern2, x2d, out_dtype, hw,
                                smem_args=(m_arr, s_arr))
            if rem:
                tf = tail.astype(jnp.float32)
                tail_out = ((tf - x_min) * s + jnp.float32(a0)).astype(out_dtype)

    out_flat = out2d.reshape(-1)
    if rem:
        # TODO(synk): the concatenate re-copies the output once for ragged n;
        # a 1-D ragged-boundary out_spec would remove this last extra pass.
        out_flat = jnp.concatenate([out_flat, tail_out])
    return out_flat.reshape(orig_shape)


def _reference(x, a=None, b=None, min_val=None, max_val=None):
    x_min = jnp.min(x) if min_val is None else min_val
    x_max = jnp.max(x) if max_val is None else max_val
    x_scaled = (x - x_min) / (x_max - x_min)
    if a is None:
        return x_scaled
    return a + x_scaled * (b - a)


if __name__ == "__main__":
    key = jax.random.PRNGKey(0)
    k1, k2, k3 = jax.random.split(key, 3)

    # NCHW input like the PyTorch transform would see (batch=2, ch=4, 16x16).
    x = jax.random.uniform(k1, (2, 4, 16, 16), dtype=jnp.float32) * 255.0

    # 1) data-dependent min/max, no [a, b] remap (fused path).
    out1 = scale(x)
    # 2) fixed range [0, 255] remapped to [-1, 1] (static elementwise path).
    out2 = scale(x, a=-1.0, b=1.0, min_val=0.0, max_val=255.0)
    # 3) data-dependent min/max with [a, b] remap (fused path).
    out3 = scale(x, a=0.0, b=1.0)
    # 4) bigger input: fused path plus forced two-pass (reduction + FMA) path
    #    to exercise the megacore reduction grid and ragged row-tiles.
    x_large = jax.random.uniform(k2, (8, 4, 128, 160), dtype=jnp.float32) * 255.0
    out4 = scale(x_large, a=-1.0, b=1.0)
    out4b = scale(x_large, a=-1.0, b=1.0, _force_two_pass=True)
    # 5) ragged flat size (n % 128 != 0): prefix kernel + jnp tail.
    x_rag = jax.random.uniform(k3, (3, 5, 7, 11), dtype=jnp.float32) * 10.0 - 5.0
    out5 = scale(x_rag, a=0.0, b=1.0)
    out5b = scale(x_rag, a=-2.0, b=2.0, min_val=-5.0, max_val=5.0)
    # 6) tiny input (< 128 elements): pure-jnp fallback.
    x_tiny = jax.random.uniform(k1, (5, 7), dtype=jnp.float32)
    out6 = scale(x_tiny)
    # 7) integer input promotes to float32 (matches torch true-division).
    x_u8 = (x / 2.0).astype(jnp.uint8)
    out7 = scale(x_u8, a=0.0, b=1.0)

    for o in (out1, out2, out3, out4, out4b, out5, out5b, out6, out7):
        jax.block_until_ready(o)

    checks = [
        (out1, _reference(x), x.dtype),
        (out2, _reference(x, a=-1.0, b=1.0, min_val=0.0, max_val=255.0), x.dtype),
        (out3, _reference(x, a=0.0, b=1.0), x.dtype),
        (out4, _reference(x_large, a=-1.0, b=1.0), x_large.dtype),
        (out4b, _reference(x_large, a=-1.0, b=1.0), x_large.dtype),
        (out5, _reference(x_rag, a=0.0, b=1.0), x_rag.dtype),
        (out5b, _reference(x_rag, a=-2.0, b=2.0, min_val=-5.0, max_val=5.0), x_rag.dtype),
        (out6, _reference(x_tiny), x_tiny.dtype),
        (out7, _reference(x_u8, a=0.0, b=1.0).astype(jnp.float32), jnp.float32),
    ]
    for got, want, want_dtype in checks:
        assert got.shape == want.shape
        assert got.dtype == want_dtype
        err = float(jnp.max(jnp.abs(got.astype(jnp.float32) - want.astype(jnp.float32))))
        assert jnp.allclose(got, want, atol=1e-5, rtol=1e-5), err

    print("KERNEL_OK")
</pallas_src>

<mosaic_0001>
module attributes {stable_mosaic.version = 11 : i64} {
  func.func @_fused_kernel(%arg0: memref<1x1xf32, #tpu.memory_space<smem>>, %arg1: memref<1x1xf32, #tpu.memory_space<smem>>, %arg2: memref<16x128xf32, #tpu.memory_space<vmem>>, %arg3: memref<16x128xf32, #tpu.memory_space<vmem>>, %arg4: memref<1x1xf32, #tpu.memory_space<smem>>, %arg5: memref<1x1xf32, #tpu.memory_space<smem>>) attributes {dimension_semantics = [], scalar_prefetch = 0 : i64, scratch_operands = 0 : i64, tpu.core_type = #tpu.core_type<tc>} {
    %c0 = arith.constant 0 : index
    %c0_0 = arith.constant 0 : index
    %0 = vector.load %arg2[%c0, %c0_0] : memref<16x128xf32, #tpu.memory_space<vmem>>, vector<16x128xf32>
    %1 = vector.shape_cast %0 : vector<16x128xf32> to vector<1x16x128xf32>
    %cst = arith.constant dense<0x7F800000> : vector<1xf32>
    %2 = vector.multi_reduction <minimumf>, %1, %cst [1, 2] : vector<1x16x128xf32> to vector<1xf32>
    %3 = vector.shape_cast %2 : vector<1xf32> to vector<1x1x1xf32>
    %4 = vector.extract %3[0, 0, 0] : f32 from vector<1x1x1xf32>
    %c0_1 = arith.constant 0 : index
    %c0_2 = arith.constant 0 : index
    %5 = memref.load %arg0[%c0_1, %c0_2] : memref<1x1xf32, #tpu.memory_space<smem>>
    %6 = arith.minimumf %4, %5 : f32
    %7 = vector.shape_cast %0 : vector<16x128xf32> to vector<1x16x128xf32>
    %cst_3 = arith.constant dense<0xFF800000> : vector<1xf32>
    %8 = vector.multi_reduction <maximumf>, %7, %cst_3 [1, 2] : vector<1x16x128xf32> to vector<1xf32>
    %9 = vector.shape_cast %8 : vector<1xf32> to vector<1x1x1xf32>
    %10 = vector.extract %9[0, 0, 0] : f32 from vector<1x1x1xf32>
    %c0_4 = arith.constant 0 : index
    %c0_5 = arith.constant 0 : index
    %11 = memref.load %arg1[%c0_4, %c0_5] : memref<1x1xf32, #tpu.memory_space<smem>>
    %12 = arith.maximumf %10, %11 : f32
    %13 = arith.subf %12, %6 : f32
    %cst_6 = arith.constant 1.000000e+00 : f32
    %14 = arith.divf %cst_6, %13 : f32
    %15 = vector.broadcast %6 : f32 to vector<16x128xf32>
    %16 = arith.subf %0, %15 : vector<16x128xf32>
    %17 = vector.broadcast %14 : f32 to vector<16x128xf32>
    %18 = arith.mulf %16, %17 : vector<16x128xf32>
    %cst_7 = arith.constant 0.000000e+00 : f32
    %19 = vector.broadcast %cst_7 : f32 to vector<16x128xf32>
    %20 = arith.addf %18, %19 : vector<16x128xf32>
    %c0_8 = arith.constant 0 : index
    %c0_9 = arith.constant 0 : index
    %21 = vector.load %arg3[%c0_8, %c0_9] : memref<16x128xf32, #tpu.memory_space<vmem>>, vector<16x128xf32>
    tpu.vector_store %arg3[%c0_8, %c0_9], %20 {strides = array<i32>} : memref<16x128xf32, #tpu.memory_space<vmem>>, vector<16x128xf32>,
    %c0_10 = arith.constant 0 : index
    %c0_11 = arith.constant 0 : index
    %22 = memref.load %arg4[%c0_10, %c0_11] : memref<1x1xf32, #tpu.memory_space<smem>>
    memref.store %6, %arg4[%c0_10, %c0_11] : memref<1x1xf32, #tpu.memory_space<smem>>
    %c0_12 = arith.constant 0 : index
    %c0_13 = arith.constant 0 : index
    %23 = memref.load %arg5[%c0_12, %c0_13] : memref<1x1xf32, #tpu.memory_space<smem>>
    memref.store %12, %arg5[%c0_12, %c0_13] : memref<1x1xf32, #tpu.memory_space<smem>>
    return
  }
}

</mosaic_0001>

<bundles_post_ra>
// kernel: tpu_custom_call.1
= control target key start
LH: loop header
LB: loop body
LE: loop exit
PB: predicated region body
PF: predicated region fallthrough
CT: control target
= control target key end

     0   :  { %13 = vsyncpa [#allocation5], 0  ;;  %s304_s0 = inlined_call_operand.<no memory space> [shape: f32[1,1], index: 0, kind: input, shape index: {}]   ;;  %s305_s1 = inlined_call_operand.<no memory space> [shape: f32[1,1], index: 1, kind: input, shape index: {}]   ;;  %s306_s2 = inlined_call_operand.hbm [shape: f32[16,128], index: 2, kind: input, shape index: {}]   ;;  %s307_s3 = inlined_call_operand.hbm [shape: f32[16,128], index: 3, kind: output, shape index: {0}]   ;;  %s308_s4 = inlined_call_operand.hbm [shape: f32[1,1], index: 4, kind: output, shape index: {1}]   ;;  %s309_s5 = inlined_call_operand.hbm [shape: f32[1,1], index: 5, kind: output, shape index: {2}]  }
   0x1   :  { %14 = vsyncpa [#allocation6], 0 }
   0x2   :  { %15 = vsyncpa [#allocation7], 0 }
   0x3   :  { %16 = vsyncpa [#allocation11], 0  ;;  %s208_s18 = smov [#allocation4]   ;;  %s136_s22 = scalar_lea.hbm %s306_s2, 256 }
   0x4   :  { %s26_s19 = sshll.u32 %s208_s18, 4  ;;  %p137_p0 = scmp.ne.s32.totalorder %s306_s2, %s136_s22  ;;  %s27_s19 = int_to_ptr.vmem [resolvable:$true] %s26_s19 }
   0x5   :  { %p140_p1 = scmp.lt.u32.totalorder %s136_s22, %s306_s2 }
   0x7   :  { %p142_p2 = pnand %p140_p1, %p137_p0 }
   0x9   :  { %145 = shalt.err (!%p142_p2)
}
   0xa   :  { %s146_s27 = scalar_lea.vmem %s27_s19, 256  ;;  %p151_p4 = scmp.lt.s32.totalorder %s27_s19, %s27_s19 }
   0xb   :  { %p147_p3 = scmp.ne.s32.totalorder %s27_s19, %s146_s27  ;;  %p152_p5 = scmp.lt.s32.totalorder %s146_s27, %s146_s27 }
   0xd   :  { %p153_p6 = por %p152_p5, %p151_p4 }
   0xf   :  { %p154_p7 = pnand %p153_p6, %p147_p3 }
  0x11   :  { %157 = shalt.err (!%p154_p7)
}
  0x12   :  { %s209_s28 = smov 128   ;;  %s210_s29 = smov 8  }
  0x13   :  { %32 = dma.hbm_to_vmem [thread:$0]  %s306_s2, 256, %s27_s19, [#allocation5], %s209_s28, %s209_s28, %s210_s29  }
  0x14   :  { %200 = dma.done.wait [#allocation5], 256  }
  0x15   :  { %201 = vsyncadd [#allocation5], 4294967040  ;;  %v36_v0 = vld [vmem:[#allocation4] sm:$0xff]  ;;  %v37_v1 = vld [vmem:[#allocation4 + $0x8] sm:$0xff]  ;;  %s158_s12 = scalar_lea.hbm %s308_s4, 16 }
  0x16   :  { %v38_v2 = vmin.f32 %v36_v0, %v37_v1  ;;  %v50_v3 = vmax.f32 %v36_v0, %v37_v1  ;;  %p159_p8 = scmp.ne.s32.totalorder %s308_s4, %s158_s12  ;;  %p162_p9 = scmp.lt.u32.totalorder %s158_s12, %s308_s4 }
  0x18   :  { %39 = vmin.xlane.f32.xlu0 %v38_v2  ;;  %p164_p10 = pnand %p162_p9, %p159_p8 }
  0x1c   :  { %51 = vmax.xlane.f32.xlu0 %v50_v3 }
  0xa5   :  { %v40_v4 = vpop.xlane.xlu0 %39 }
  0xa6   :  { %v41_v5 = vrot.slane %v40_v4, 4 }
  0xa8   :  { %v42_v6 = vmin.f32 %v40_v4, %v41_v5 }
  0xa9   :  { %v52_v7 = vpop.xlane.xlu0 %51 }
  0xaa   :  { %v43_v8 = vrot.slane %v42_v6, 2  ;;  %v53_v9 = vrot.slane %v52_v7, 4 }
  0xac   :  { %v54_v10 = vmax.f32 %v52_v7, %v53_v9  ;;  %v44_v11 = vmin.f32 %v42_v6, %v43_v8 }
  0xae   :  { %v55_v12 = vrot.slane %v54_v10, 2  ;;  %v45_v13 = vrot.slane %v44_v11, 1 }
  0xb0   :  { %v56_v14 = vmax.f32 %v54_v10, %v55_v12  ;;  %v46_v15 = vmin.f32 %v44_v11, %v45_v13 }
  0xb2   :  { %122 = vpush %v46_v15  ;;  %v57_v16 = vrot.slane %v56_v14, 1 }
  0xb4   :  { %v58_v17 = vmax.f32 %v56_v14, %v57_v16 }
  0xb6   :  { %124 = vpush %v58_v17 }
  0xe3   :  { %s123_s2 = spop %122 }
  0xe4   :  { %s49_s9 = smin.f32 %s123_s2, %s304_s0 }
  0xe5   :  { %77 = sst [smem:[#allocation9]] %s49_s9 }
  0xe6   :  { %167 = shalt.err (!%p164_p10)
}
  0xe7   :  { %s211_s17 = smov [#allocation9]   ;;  %s125_s0 = spop %124 }
  0xe8   :  { %99 = dma.smem_to_hbm %s211_s17, 16, %s308_s4, [#allocation7]  }
  0xe9   :  { %s61_s22 = smax.f32 %s125_s0, %s305_s1  ;;  %s168_s26 = scalar_lea.hbm %s309_s5, 16 }
  0xea   :  { %s62_s23 = ssub.f32 %s61_s22, %s49_s9  ;;  %p169_p11 = scmp.ne.s32.totalorder %s309_s5, %s168_s26 }
  0xeb   :  { %79 = sst [smem:[#allocation10]] %s61_s22  ;;  %p172_p12 = scmp.lt.u32.totalorder %s168_s26, %s309_s5 }
  0xec   :  { %v63_v18 = vstv %s62_s23 }
  0xed   :  { %p174_p13 = pnand %p172_p12, %p169_p11 }
  0xef   :  { %177 = shalt.err (!%p174_p13)
}
  0xf0   :  { %s212_s4 = smov [#allocation10]   ;;  %134 = vrcp.f32 %v63_v18  ;;  %v66_v20 = vstv %s49_s9  ;;  %s213_s8 = smov [#allocation8]  }
  0xf1   :  { %107 = dma.smem_to_hbm %s212_s4, 16, %s309_s5, [#allocation11]   ;;  %v67_v21 = vsub.f32 %v36_v0, %v66_v20  ;;  %v68_v22 = vsub.f32 %v37_v1, %v66_v20 }
  0xf2   :  { %s85_s10 = sshll.u32 %s213_s8, 4  ;;  %s86_s10 = int_to_ptr.vmem [resolvable:$true] %s85_s10 }
  0xf3   :  { %s178_s12 = scalar_lea.vmem %s86_s10, 256  ;;  %p183_p1 = scmp.lt.s32.totalorder %s86_s10, %s86_s10 }
  0xf4   :  { %p179_p0 = scmp.ne.s32.totalorder %s86_s10, %s178_s12  ;;  %p184_p2 = scmp.lt.s32.totalorder %s178_s12, %s178_s12 }
  0xf6   :  { %p185_p3 = por %p184_p2, %p183_p1 }
  0xf8   :  { %p186_p4 = pnand %p185_p3, %p179_p0 }
  0xfa   :  { %v135_v19 = vpop.eup %134 }
  0xfb   :  { %126 = vpush %v135_v19 }
 0x12c   :  { %s127_s11 = spop %126 }
 0x12d   :  { %v69_v23 = vstv %s127_s11 }
 0x12e   :  { %v70_v24 = vmul.f32 %v69_v23, %v67_v21  ;;  %v71_v25 = vmul.f32 %v69_v23, %v68_v22 }
 0x130   :  { %74 = vst [vmem:[#allocation8] sm:$0xff] %v70_v24  ;;  %75 = vst [vmem:[#allocation8 + $0x8] sm:$0xff] %v71_v25 }
 0x131   :  { %189 = shalt.err (!%p186_p4)
}
 0x132   :  { %s190_s13 = scalar_lea.hbm %s307_s3, 256 }
 0x133   :  { %p191_p5 = scmp.ne.s32.totalorder %s307_s3, %s190_s13  ;;  %p194_p6 = scmp.lt.u32.totalorder %s190_s13, %s307_s3 }
 0x135   :  { %p196_p7 = pnand %p194_p6, %p191_p5 }
 0x137   :  { %199 = shalt.err (!%p196_p7)
}
 0x138   :  { %91 = dma.vmem_to_hbm [thread:$0]  %s86_s10, 256, %s307_s3, [#allocation6], %s209_s28, %s209_s28, %s210_s29  }
 0x139   :  { %202 = dma.done.wait [#allocation6], 256  }
 0x13a   :  { %203 = vsyncadd [#allocation6], 4294967040 }
 0x13b   :  { %204 = dma.done.wait [#allocation7], 16  }
 0x13c   :  { %205 = vsyncadd [#allocation7], 4294967280 }
 0x13d   :  { %206 = dma.done.wait [#allocation11], 16  }
 0x13e   :  { %207 = vsyncadd [#allocation11], 4294967280 }
 0x13f   :  { %117 = sfence }
 0x140   :  { %118 = vsyncpa [#allocation5], 1 }
 0x141   :  { %119 = vsyncpa [#allocation6], 1 }
 0x142   :  { %120 = vsyncpa [#allocation7], 1 }
 0x143   :  { %121 = vsyncpa [#allocation11], 1 }

</bundles_post_ra>
